<compile_context>
chip_gen: v5e
topology: v5e:2x2
jax: 0.10.0
libtpu: 0.0.40
codegen_flags: <defaults>
</compile_context>

<pallas_src>
import math

import jax
import jax.numpy as jnp
from jax.experimental import pallas as pl
from jax.experimental.pallas import tpu as pltpu


def _cdiv(a, b):
    return (a + b - 1) // b


def _round_up(a, b):
    return _cdiv(a, b) * b


def _pick_tile(dim, max_tile, granularity):
    """Tile size for one axis.

    * If the whole axis fits in one tile, use the full extent (no padding and
      no (8,128) divisibility requirement — full-extent blocks are exempt).
    * Otherwise return a granularity-aligned tile chosen so the padded extent
      overshoots by at most (n_tiles - 1) granules instead of a full max_tile.
    """
    if dim <= max_tile:
        return dim
    blocks = _cdiv(dim, granularity)
    max_blocks = max(max_tile // granularity, 1)
    n_tiles = _cdiv(blocks, max_blocks)
    return _cdiv(blocks, n_tiles) * granularity


def _vmem_limit_bytes(tile_bytes):
    """Scoped-VMEM limit: enough for double-buffered tiles, capped to hardware."""
    try:
        cap = getattr(pltpu.get_tpu_info(), "vmem_capacity_bytes",
                      64 * 1024 * 1024)
    except Exception:  # interpret mode / unknown chip
        cap = 64 * 1024 * 1024  # v7x per-TC is the smallest
    want = max(int(2.5 * tile_bytes), 32 * 1024 * 1024)
    return int(min(0.75 * cap, want))


def _embed_matmul_kernel(x_ref, w_ref, o_ref):
    """One (tm, tn) output tile; accumulate directly into o_ref over k."""
    partial = jnp.dot(x_ref[...], w_ref[...],
                      preferred_element_type=jnp.float32)
    k = pl.program_id(2)

    @pl.when(k == 0)
    def _():
        o_ref[...] = partial

    @pl.when(k > 0)
    def _():
        o_ref[...] += partial


def embedding_forward(x, embedding, *, tm=256, tk=1024, tn=2048):
    """Pallas equivalent of Embedding.forward.

    x:         [N, input_size]   (non-float dtypes are widened like .float())
    embedding: [input_size, embedding_size] float32
    returns:   [N, embedding_size] float32
    """
    n, k = x.shape
    k2, e = embedding.shape
    assert k == k2, "input feature dim must match embedding rows"

    # torch does input.float(); feed float dtypes natively (MXU widens via
    # preferred_element_type), only cast genuinely non-float inputs.
    if not jnp.issubdtype(x.dtype, jnp.floating):
        x = x.astype(jnp.float32)

    # ---- tile selection (full extent when it fits => no padding) ----------
    tm_eff = _pick_tile(n, tm, 8)      # sublane granularity
    tk_eff = _pick_tile(k, tk, 128)    # lane granularity (x last dim)
    tn_eff = _pick_tile(e, tn, 128)    # lane granularity (out last dim)

    # v7x has 2 TensorCores: if N collapses to one m-tile, make sure the
    # "parallel" j axis still has >= 2 programs (only when it costs no padding).
    if _cdiv(n, tm_eff) == 1 and tn_eff == e and e >= 256 and e % 256 == 0:
        tn_eff = e // 2

    n_p = _round_up(n, tm_eff)
    k_p = _round_up(k, tk_eff)
    e_p = _round_up(e, tn_eff)

    # Zero padding only when a dimension exceeds its tile and is unaligned.
    # (Zeros contribute nothing to the dot product.)  For large non-aligned
    # weights, prefer padding the parameter once at init instead of per call.
    x_p = x if (n_p, k_p) == (n, k) else jnp.pad(x, ((0, n_p - n), (0, k_p - k)))
    w_p = (embedding if (k_p, e_p) == (k, e)
           else jnp.pad(embedding, ((0, k_p - k), (0, e_p - e))))

    grid_i, grid_j, grid_k = n_p // tm_eff, e_p // tn_eff, k_p // tk_eff
    grid = (grid_i, grid_j, grid_k)  # reduction axis (K) last

    xb = x_p.dtype.itemsize
    wb = w_p.dtype.itemsize
    tile_bytes = (tm_eff * tk_eff * xb      # x tile
                  + tk_eff * tn_eff * wb    # W tile
                  + tm_eff * tn_eff * 4)    # resident f32 output tile

    # Actual traffic: x re-read per j tile, W re-streamed per i tile.
    cost = pl.CostEstimate(
        flops=2 * n_p * k_p * e_p,
        transcendentals=0,
        bytes_accessed=(x_p.size * xb * grid_j
                        + w_p.size * wb * grid_i
                        + n_p * e_p * 4),
    )

    out_p = pl.pallas_call(
        _embed_matmul_kernel,
        out_shape=jax.ShapeDtypeStruct((n_p, e_p), jnp.float32),
        grid_spec=pltpu.PrefetchScalarGridSpec(
            num_scalar_prefetch=0,
            grid=grid,
            in_specs=[
                pl.BlockSpec((tm_eff, tk_eff), lambda i, j, kk: (i, kk)),
                pl.BlockSpec((tk_eff, tn_eff), lambda i, j, kk: (kk, j)),
            ],
            out_specs=pl.BlockSpec((tm_eff, tn_eff), lambda i, j, kk: (i, j)),
        ),
        compiler_params=pltpu.CompilerParams(
            dimension_semantics=("parallel", "parallel", "arbitrary"),
            vmem_limit_bytes=_vmem_limit_bytes(tile_bytes),
        ),
        cost_estimate=cost,
    )(x_p, w_p)

    if (n_p, e_p) == (n, e):
        return out_p
    return out_p[:n, :e]


def init_embedding_params(key, input_size, embedding_size):
    # Matches nn.Parameter(...).uniform_(-1/sqrt(E), 1/sqrt(E))
    bound = 1.0 / math.sqrt(embedding_size)
    return jax.random.uniform(
        key, (input_size, embedding_size), dtype=jnp.float32,
        minval=-bound, maxval=bound,
    )


if __name__ == "__main__":
    key = jax.random.PRNGKey(0)
    k_w, k_x = jax.random.split(key)

    input_size = 16
    embedding_size = 32
    batch = 8

    embedding = init_embedding_params(k_w, input_size, embedding_size)
    x = jax.random.normal(k_x, (batch, input_size), dtype=jnp.float32)

    out = embedding_forward(x, embedding)
    out = jax.block_until_ready(out)

    # Correctness check against plain-JAX reference of the torch forward.
    ref = jnp.matmul(x[None, ...].astype(jnp.float32), embedding)[0]
    assert out.shape == (batch, embedding_size)
    assert jnp.allclose(out, ref, atol=1e-5, rtol=1e-5)

    print("KERNEL_OK")
</pallas_src>

<mosaic_0001>
module attributes {stable_mosaic.version = 11 : i64} {
  func.func @_embed_matmul_kernel(%arg0: i32, %arg1: i32, %arg2: i32, %arg3: memref<8x16xf32, #tpu.memory_space<vmem>>, %arg4: memref<16x32xf32, #tpu.memory_space<vmem>>, %arg5: memref<8x32xf32, #tpu.memory_space<vmem>>) attributes {dimension_semantics = [#tpu.dimension_semantics<parallel>, #tpu.dimension_semantics<parallel>, #tpu.dimension_semantics<arbitrary>], iteration_bounds = array<i64: 1, 1, 1>, scalar_prefetch = 0 : i64, scratch_operands = 0 : i64, tpu.core_type = #tpu.core_type<tc>, window_params = [{transform_indices = @transform_0, window_bounds = array<i64: 8, 16>}, {transform_indices = @transform_1, window_bounds = array<i64: 16, 32>}, {transform_indices = @transform_2, window_bounds = array<i64: 8, 32>}]} {
    %c0 = arith.constant 0 : index
    %c0_0 = arith.constant 0 : index
    %0 = vector.load %arg3[%c0, %c0_0] : memref<8x16xf32, #tpu.memory_space<vmem>>, vector<8x16xf32>
    %c0_1 = arith.constant 0 : index
    %c0_2 = arith.constant 0 : index
    %1 = vector.load %arg4[%c0_1, %c0_2] : memref<16x32xf32, #tpu.memory_space<vmem>>, vector<16x32xf32>
    %cst = arith.constant dense<0.000000e+00> : vector<8x32xf32>
    %2 = tpu.matmul %0, %1, %cst {dimension_numbers = #tpu.dot_dimension_numbers<[1], [0], [0], [1], [0, 0, 1, 1], [], []>} : vector<8x16xf32>, vector<16x32xf32>, vector<8x32xf32> -> vector<8x32xf32>
    %c0_i32 = arith.constant 0 : i32
    %3 = arith.cmpi eq, %arg2, %c0_i32 : i32
    %4 = arith.extui %3 : i1 to i32
    %c0_i32_3 = arith.constant 0 : i32
    %5 = arith.cmpi ne, %4, %c0_i32_3 : i32
    scf.if %5 {
      %c0_6 = arith.constant 0 : index
      %c0_7 = arith.constant 0 : index
      %9 = vector.load %arg5[%c0_6, %c0_7] : memref<8x32xf32, #tpu.memory_space<vmem>>, vector<8x32xf32>
      tpu.vector_store %arg5[%c0_6, %c0_7], %2 {strides = array<i32>} : memref<8x32xf32, #tpu.memory_space<vmem>>, vector<8x32xf32>,
    } else {
    }
    %c0_i32_4 = arith.constant 0 : i32
    %6 = arith.cmpi sgt, %arg2, %c0_i32_4 : i32
    %7 = arith.extui %6 : i1 to i32
    %c0_i32_5 = arith.constant 0 : i32
    %8 = arith.cmpi ne, %7, %c0_i32_5 : i32
    scf.if %8 {
      %c0_6 = arith.constant 0 : index
      %c0_7 = arith.constant 0 : index
      %9 = vector.load %arg5[%c0_6, %c0_7] : memref<8x32xf32, #tpu.memory_space<vmem>>, vector<8x32xf32>
      %10 = arith.addf %9, %2 : vector<8x32xf32>
      %c0_8 = arith.constant 0 : index
      %c0_9 = arith.constant 0 : index
      %11 = vector.load %arg5[%c0_8, %c0_9] : memref<8x32xf32, #tpu.memory_space<vmem>>, vector<8x32xf32>
      tpu.vector_store %arg5[%c0_8, %c0_9], %10 {strides = array<i32>} : memref<8x32xf32, #tpu.memory_space<vmem>>, vector<8x32xf32>,
    } else {
    }
    return
  }
  func.func @transform_0(%arg0: i32, %arg1: i32, %arg2: i32) -> (i32, i32) {
    %c0_i32 = arith.constant 0 : i32
    return %arg0, %arg2 : i32, i32
  }
  func.func @transform_1(%arg0: i32, %arg1: i32, %arg2: i32) -> (i32, i32) {
    %c0_i32 = arith.constant 0 : i32
    return %arg2, %arg1 : i32, i32
  }
  func.func @transform_2(%arg0: i32, %arg1: i32, %arg2: i32) -> (i32, i32) {
    %c0_i32 = arith.constant 0 : i32
    return %arg0, %arg1 : i32, i32
  }
}

</mosaic_0001>

<bundles_post_ra>
// kernel: tpu_custom_call.1
= control target key start
LH: loop header
LB: loop body
LE: loop exit
PB: predicated region body
PF: predicated region fallthrough
CT: control target
= control target key end

     0   :  { %7 = vsyncpa [#allocation3], 0  ;;  %s214_s0 = inlined_call_operand.hbm [shape: f32[8,16], index: 0, kind: input, shape index: {}]   ;;  %s215_s1 = inlined_call_operand.hbm [shape: f32[16,32], index: 1, kind: input, shape index: {}]   ;;  %s216_s2 = inlined_call_operand.hbm [shape: f32[8,32], index: 2, kind: output, shape index: {}]  }
   0x1   :  { %8 = vsyncpa [#allocation6], 0 }
   0x2   :  { %9 = vsyncpa [#allocation4], 0  ;;  %s15_s11 = sshll.u32 %s214_s0, 4  ;;  %s185_s12 = smov [#allocation2]   ;;  %s16_s11 = int_to_ptr.hbm [resolvable:$true] %s15_s11 }
   0x3   :  { %s17_s13 = sshll.u32 %s185_s12, 4  ;;  %s25_s16 = sshll.u32 %s215_s1, 4  ;;  %s18_s13 = int_to_ptr.vmem [resolvable:$true] %s17_s13  ;;  %s26_s16 = int_to_ptr.hbm [resolvable:$true] %s25_s16 }
   0x4   :  { %20 = dma.hbm_to_vmem [thread:$0]  %s16_s11, 128, %s18_s13, [#allocation3]  }
   0x5   :  { %s186_s17 = smov [#allocation5]   ;;  %s187_s19 = smov 128  }
   0x6   :  { %s27_s18 = sshll.u32 %s186_s17, 4  ;;  %s188_s20 = smov 8   ;;  %s28_s18 = int_to_ptr.vmem [resolvable:$true] %s27_s18 }
   0x7   :  { %33 = dma.hbm_to_vmem [thread:$0]  %s26_s16, 256, %s28_s18, [#allocation6], %s187_s19, %s187_s19, %s188_s20  }
   0x8   :  { %179 = dma.done.wait [#allocation3], 128  }
   0x9   :  { %180 = vsyncadd [#allocation3], 4294967168 }
   0xa   :  { %181 = dma.done.wait [#allocation6], 256  }
   0xb   :  { %182 = vsyncadd [#allocation6], 4294967040  ;;  %v44_v0 = vld [vmem:[#allocation5 + $0x8] sm:$0xff]  ;;  %v43_v1 = vld [vmem:[#allocation5] sm:$0xff]  ;;  %vm45_vm0 = vcmask 130048   ;;  %s189_s0 = smov [#allocation7]  }
   0xc   :  { %63 = vmatpush.msra.mxu0 %v44_v0  ;;  %v42_v2 = vld [vmem:[#allocation2] sm:$0xff]  ;;  %s88_s1 = sshll.u32 %s189_s0, 4  ;;  %s90_s23 = sshll.u32 %s216_s2, 4  ;;  %vm73_vm1 = vcmask 261120   ;;  %s89_s1 = int_to_ptr.vmem [resolvable:$true] %s88_s1  ;;  %s91_s23 = int_to_ptr.hbm [resolvable:$true] %s90_s23 }
   0xe   :  { %64 = vmatpush.msra.mxu0 %v43_v1 }
   0xf   :  { %101 = vmatmul.msk.f32.vlgmr.msra.gmra.mxu0 %vm45_vm0, %v42_v2 }
  0x8c   :  { %v66_v3 = vpop.f32.mrf.mxu0 }
  0x8d   :  { %74 = vst.msk [vmem:[#allocation7] sm:$0xff] %vm73_vm1, %v66_v3 }
  0x8e   :  { %93 = dma.vmem_to_hbm [thread:$0]  %s89_s1, 128, %s91_s23, [#allocation4]  }
  0x8f   :  { %183 = dma.done.wait [#allocation4], 128  }
  0x90   :  { %184 = vsyncadd [#allocation4], 4294967168 }
  0x91   :  { %98 = vsyncpa [#allocation3], 1 }
  0x92   :  { %99 = vsyncpa [#allocation6], 1 }
  0x93   :  { %100 = vsyncpa [#allocation4], 1 }

</bundles_post_ra>
